<compile_context>
chip_gen: v7x
topology: tpu7x:2x2x1
jax: 0.10.0
libtpu: 0.0.40
codegen_flags: <defaults>
</compile_context>

<pallas_src>
import jax
import jax.numpy as jnp
from jax import lax
from jax.experimental import pallas as pl
from jax.experimental.pallas import tpu as pltpu

GAMMA = 0.1          # gamma from the nESRGAN+ paper (module __init__)
_LANES = 512         # lane-dense output slab (>=128, wide -> unmasked vst, big DMAs)
_ROW_BLK = 1024      # (1024, 512) f32 block = 2 MiB per buffer

# Acklam inverse-normal-CDF coefficients (central / tail rational approximations)
_A = (-3.969683028665376e+01, 2.209460984245205e+02, -2.759285104469687e+02,
      1.383577518672690e+02, -3.066479806614716e+01, 2.506628277459239e+00)
_B = (-5.447609879822406e+01, 1.615858368580409e+02, -1.556989798598866e+02,
      6.680131188771972e+01, -1.328068155288572e+01)
_C = (-7.784894002430293e-03, -3.223964580411365e-01, -2.400758277161838e+00,
      -2.549732539343734e+00, 4.374664141464968e+00, 2.938163982698783e+00)
_D = (7.784695709041462e-03, 3.224671290700398e-01, 2.445134137142996e+00,
      3.754408661907416e+00)
_P_LOW = 0.02425


def _gaussian_noise_kernel(seed_ref, x_ref, o_ref):
    rows, lanes = x_ref.shape           # static block shape
    blk = pl.program_id(0)
    x = x_ref[...].astype(jnp.float32)

    # --- counter-based PRNG: globally unique element index -> lowbias32 hash ---
    row_ids = lax.broadcasted_iota(jnp.int32, (rows, lanes), 0)
    col_ids = lax.broadcasted_iota(jnp.int32, (rows, lanes), 1)
    gidx = (row_ids + blk * rows) * lanes + col_ids        # unique per element (wraps mod 2^32)
    h = (gidx.astype(jnp.uint32)
         + seed_ref[0].astype(jnp.uint32) * jnp.uint32(0x9E3779B9)
         + jnp.uint32(0x85EBCA6B))                         # salt so (idx=0, seed=0) isn't degenerate
    h = h ^ (h >> 16)
    h = h * jnp.uint32(0x7FEB352D)
    h = h ^ (h >> 15)
    h = h * jnp.uint32(0x846CA68B)
    h = h ^ (h >> 16)

    # uniform in (0, 1): top 23 bits + half-ulp offset (never exactly 0 or 1)
    u = ((h >> 9).astype(jnp.int32).astype(jnp.float32) + 0.5) * (1.0 / (1 << 23))

    # --- standard normal via Acklam's inverse CDF (1 log + 1 sqrt + 1 div / elem) ---
    p = jnp.minimum(u, 1.0 - u)                            # mirror into (0, 0.5]
    # central branch
    q = p - 0.5
    r = q * q
    num_c = ((((_A[0] * r + _A[1]) * r + _A[2]) * r + _A[3]) * r + _A[4]) * r + _A[5]
    den_c = ((((_B[0] * r + _B[1]) * r + _B[2]) * r + _B[3]) * r + _B[4]) * r + 1.0
    # tail branch
    t = jnp.sqrt(-2.0 * jnp.log(p))
    num_t = ((((_C[0] * t + _C[1]) * t + _C[2]) * t + _C[3]) * t + _C[4]) * t + _C[5]
    den_t = (((_D[0] * t + _D[1]) * t + _D[2]) * t + _D[3]) * t + 1.0

    is_tail = p < _P_LOW
    z_neg = jnp.where(is_tail, num_t, q * num_c) / jnp.where(is_tail, den_t, den_c)
    z = jnp.where(u < 0.5, z_neg, -z_neg)                  # z ~ N(0, 1)

    # torch.normal(mean=x, std=gamma*x)  ==  x + (gamma*x)*z  ==  x*(1 + gamma*z)
    o_ref[...] = (x * (1.0 + GAMMA * z)).astype(o_ref.dtype)


def gaussian_noise(x: jax.Array, seed: int = 0, training: bool = True) -> jax.Array:
    """Pallas TPU implementation of GaussianNoise.forward."""
    if not training:
        return x                                            # eval mode: identity

    orig_shape = x.shape
    orig_dtype = x.dtype
    flat = x.reshape(-1)
    total = flat.shape[0]

    # Pick the widest lane count that divides the tensor (shrink for tiny inputs
    # so we don't over-pad); only pad when strictly necessary.
    lanes = _LANES
    while lanes > 128 and total % lanes != 0:
        lanes //= 2
    pad = (-total) % lanes
    if pad:
        # TODO(synk): for huge non-divisible activations, process the divisible
        # prefix with the kernel and the tiny tail separately instead of padding.
        flat = jnp.pad(flat, (0, pad))
    x2d = flat.reshape(-1, lanes)
    rows = x2d.shape[0]

    row_blk = rows if rows <= _ROW_BLK else _ROW_BLK        # full dim or multiple of 8
    grid = (pl.cdiv(rows, row_blk),)

    seed_arr = jnp.array([seed], dtype=jnp.int32)

    out2d = pl.pallas_call(
        _gaussian_noise_kernel,
        out_shape=jax.ShapeDtypeStruct((rows, lanes), orig_dtype),
        grid_spec=pltpu.PrefetchScalarGridSpec(
            num_scalar_prefetch=1,
            grid=grid,
            in_specs=[pl.BlockSpec((row_blk, lanes), lambda i, seed: (i, 0))],
            out_specs=pl.BlockSpec((row_blk, lanes), lambda i, seed: (i, 0)),
        ),
        compiler_params=pltpu.CompilerParams(
            dimension_semantics=("parallel",),               # shards blocks across v7x's 2 TCs
        ),
    )(seed_arr, x2d)

    out = out2d.reshape(-1)
    if pad:
        out = out[:total]
    return out.reshape(orig_shape)


if __name__ == "__main__":
    key = jax.random.PRNGKey(0)
    # NCHW input, small shapes consistent with a conv-net feature map
    x = jax.random.normal(key, (2, 4, 16, 16), dtype=jnp.float32)

    y = gaussian_noise(x, seed=0, training=True)
    y = jax.block_until_ready(y)

    # basic sanity checks
    assert y.shape == x.shape
    assert y.dtype == x.dtype
    assert bool(jnp.all(jnp.isfinite(y)))
    resid = y - x
    assert 0.01 < float(jnp.std(resid)) < 1.0   # noise magnitude ~ gamma*|x|

    # a different seed gives different noise
    y2 = jax.block_until_ready(gaussian_noise(x, seed=1, training=True))
    assert float(jnp.max(jnp.abs(y2 - y))) > 0.0

    # eval mode is identity
    y_eval = jax.block_until_ready(gaussian_noise(x, seed=0, training=False))
    assert bool(jnp.all(y_eval == x))

    print("KERNEL_OK")
</pallas_src>

<mosaic_0001>
module attributes {stable_mosaic.version = 11 : i64} {
  func.func @_gaussian_noise_kernel(%arg0: i32, %arg1: memref<1xi32, #tpu.memory_space<smem>>, %arg2: memref<4x512xf32, #tpu.memory_space<vmem>>, %arg3: memref<4x512xf32, #tpu.memory_space<vmem>>) attributes {dimension_semantics = [#tpu.dimension_semantics<parallel>], iteration_bounds = array<i64: 1>, scalar_prefetch = 1 : i64, scratch_operands = 0 : i64, tpu.core_type = #tpu.core_type<tc>, window_params = [{transform_indices = @transform_0, window_bounds = array<i64: 4, 512>}, {transform_indices = @transform_1, window_bounds = array<i64: 4, 512>}]} {
    %c0 = arith.constant 0 : index
    %c0_0 = arith.constant 0 : index
    %0 = vector.load %arg2[%c0, %c0_0] : memref<4x512xf32, #tpu.memory_space<vmem>>, vector<4x512xf32>
    %1 = tpu.iota {dimensions = array<i32: 0>} : vector<4x512xi32>
    %2 = tpu.iota {dimensions = array<i32: 1>} : vector<4x512xi32>
    %c4_i32 = arith.constant 4 : i32
    %3 = arith.muli %arg0, %c4_i32 : i32
    %4 = vector.broadcast %3 : i32 to vector<4x512xi32>
    %5 = arith.addi %1, %4 : vector<4x512xi32>
    %c512_i32 = arith.constant 512 : i32
    %6 = vector.broadcast %c512_i32 : i32 to vector<4x512xi32>
    %7 = arith.muli %5, %6 : vector<4x512xi32>
    %8 = arith.addi %7, %2 : vector<4x512xi32>
    %c0_1 = arith.constant 0 : index
    %9 = memref.load %arg1[%c0_1] : memref<1xi32, #tpu.memory_space<smem>>
    %c-1640531527_i32 = arith.constant -1640531527 : i32
    %10 = arith.muli %9, %c-1640531527_i32 : i32
    %11 = vector.broadcast %10 : i32 to vector<4x512xi32>
    %12 = arith.addi %8, %11 : vector<4x512xi32>
    %c-2048144789_i32 = arith.constant -2048144789 : i32
    %13 = vector.broadcast %c-2048144789_i32 : i32 to vector<4x512xi32>
    %14 = arith.addi %12, %13 : vector<4x512xi32>
    %c16_i32 = arith.constant 16 : i32
    %15 = vector.broadcast %c16_i32 : i32 to vector<4x512xi32>
    %16 = arith.shrui %14, %15 : vector<4x512xi32>
    %17 = arith.xori %14, %16 : vector<4x512xi32>
    %c2146121005_i32 = arith.constant 2146121005 : i32
    %18 = vector.broadcast %c2146121005_i32 : i32 to vector<4x512xi32>
    %19 = arith.muli %17, %18 : vector<4x512xi32>
    %c15_i32 = arith.constant 15 : i32
    %20 = vector.broadcast %c15_i32 : i32 to vector<4x512xi32>
    %21 = arith.shrui %19, %20 : vector<4x512xi32>
    %22 = arith.xori %19, %21 : vector<4x512xi32>
    %c-2073254261_i32 = arith.constant -2073254261 : i32
    %23 = vector.broadcast %c-2073254261_i32 : i32 to vector<4x512xi32>
    %24 = arith.muli %22, %23 : vector<4x512xi32>
    %c16_i32_2 = arith.constant 16 : i32
    %25 = vector.broadcast %c16_i32_2 : i32 to vector<4x512xi32>
    %26 = arith.shrui %24, %25 : vector<4x512xi32>
    %27 = arith.xori %24, %26 : vector<4x512xi32>
    %c9_i32 = arith.constant 9 : i32
    %28 = vector.broadcast %c9_i32 : i32 to vector<4x512xi32>
    %29 = arith.shrui %27, %28 : vector<4x512xi32>
    %30 = arith.sitofp %29 : vector<4x512xi32> to vector<4x512xf32>
    %cst = arith.constant 5.000000e-01 : f32
    %31 = vector.broadcast %cst : f32 to vector<4x512xf32>
    %32 = arith.addf %30, %31 : vector<4x512xf32>
    %cst_3 = arith.constant 1.1920929E-7 : f32
    %33 = vector.broadcast %cst_3 : f32 to vector<4x512xf32>
    %34 = arith.mulf %32, %33 : vector<4x512xf32>
    %cst_4 = arith.constant 1.000000e+00 : f32
    %35 = vector.broadcast %cst_4 : f32 to vector<4x512xf32>
    %36 = arith.subf %35, %34 : vector<4x512xf32>
    %37 = arith.minimumf %34, %36 : vector<4x512xf32>
    %cst_5 = arith.constant 5.000000e-01 : f32
    %38 = vector.broadcast %cst_5 : f32 to vector<4x512xf32>
    %39 = arith.subf %37, %38 : vector<4x512xf32>
    %40 = arith.mulf %39, %39 : vector<4x512xf32>
    %cst_6 = arith.constant -39.6968307 : f32
    %41 = vector.broadcast %cst_6 : f32 to vector<4x512xf32>
    %42 = arith.mulf %41, %40 : vector<4x512xf32>
    %cst_7 = arith.constant 220.946106 : f32
    %43 = vector.broadcast %cst_7 : f32 to vector<4x512xf32>
    %44 = arith.addf %42, %43 : vector<4x512xf32>
    %45 = arith.mulf %44, %40 : vector<4x512xf32>
    %cst_8 = arith.constant -275.928497 : f32
    %46 = vector.broadcast %cst_8 : f32 to vector<4x512xf32>
    %47 = arith.addf %45, %46 : vector<4x512xf32>
    %48 = arith.mulf %47, %40 : vector<4x512xf32>
    %cst_9 = arith.constant 138.357758 : f32
    %49 = vector.broadcast %cst_9 : f32 to vector<4x512xf32>
    %50 = arith.addf %48, %49 : vector<4x512xf32>
    %51 = arith.mulf %50, %40 : vector<4x512xf32>
    %cst_10 = arith.constant -30.6647987 : f32
    %52 = vector.broadcast %cst_10 : f32 to vector<4x512xf32>
    %53 = arith.addf %51, %52 : vector<4x512xf32>
    %54 = arith.mulf %53, %40 : vector<4x512xf32>
    %cst_11 = arith.constant 2.50662827 : f32
    %55 = vector.broadcast %cst_11 : f32 to vector<4x512xf32>
    %56 = arith.addf %54, %55 : vector<4x512xf32>
    %cst_12 = arith.constant -54.4760971 : f32
    %57 = vector.broadcast %cst_12 : f32 to vector<4x512xf32>
    %58 = arith.mulf %57, %40 : vector<4x512xf32>
    %cst_13 = arith.constant 161.585831 : f32
    %59 = vector.broadcast %cst_13 : f32 to vector<4x512xf32>
    %60 = arith.addf %58, %59 : vector<4x512xf32>
    %61 = arith.mulf %60, %40 : vector<4x512xf32>
    %cst_14 = arith.constant -155.698975 : f32
    %62 = vector.broadcast %cst_14 : f32 to vector<4x512xf32>
    %63 = arith.addf %61, %62 : vector<4x512xf32>
    %64 = arith.mulf %63, %40 : vector<4x512xf32>
    %cst_15 = arith.constant 66.8013153 : f32
    %65 = vector.broadcast %cst_15 : f32 to vector<4x512xf32>
    %66 = arith.addf %64, %65 : vector<4x512xf32>
    %67 = arith.mulf %66, %40 : vector<4x512xf32>
    %cst_16 = arith.constant -13.2806816 : f32
    %68 = vector.broadcast %cst_16 : f32 to vector<4x512xf32>
    %69 = arith.addf %67, %68 : vector<4x512xf32>
    %70 = arith.mulf %69, %40 : vector<4x512xf32>
    %cst_17 = arith.constant 1.000000e+00 : f32
    %71 = vector.broadcast %cst_17 : f32 to vector<4x512xf32>
    %72 = arith.addf %70, %71 : vector<4x512xf32>
    %73 = math.log %37 : vector<4x512xf32>
    %cst_18 = arith.constant -2.000000e+00 : f32
    %74 = vector.broadcast %cst_18 : f32 to vector<4x512xf32>
    %75 = arith.mulf %74, %73 : vector<4x512xf32>
    %76 = math.sqrt %75 : vector<4x512xf32>
    %cst_19 = arith.constant -0.0077848942 : f32
    %77 = vector.broadcast %cst_19 : f32 to vector<4x512xf32>
    %78 = arith.mulf %77, %76 : vector<4x512xf32>
    %cst_20 = arith.constant -0.322396457 : f32
    %79 = vector.broadcast %cst_20 : f32 to vector<4x512xf32>
    %80 = arith.addf %78, %79 : vector<4x512xf32>
    %81 = arith.mulf %80, %76 : vector<4x512xf32>
    %cst_21 = arith.constant -2.40075827 : f32
    %82 = vector.broadcast %cst_21 : f32 to vector<4x512xf32>
    %83 = arith.addf %81, %82 : vector<4x512xf32>
    %84 = arith.mulf %83, %76 : vector<4x512xf32>
    %cst_22 = arith.constant -2.54973245 : f32
    %85 = vector.broadcast %cst_22 : f32 to vector<4x512xf32>
    %86 = arith.addf %84, %85 : vector<4x512xf32>
    %87 = arith.mulf %86, %76 : vector<4x512xf32>
    %cst_23 = arith.constant 4.37466431 : f32
    %88 = vector.broadcast %cst_23 : f32 to vector<4x512xf32>
    %89 = arith.addf %87, %88 : vector<4x512xf32>
    %90 = arith.mulf %89, %76 : vector<4x512xf32>
    %cst_24 = arith.constant 2.938164 : f32
    %91 = vector.broadcast %cst_24 : f32 to vector<4x512xf32>
    %92 = arith.addf %90, %91 : vector<4x512xf32>
    %cst_25 = arith.constant 0.00778469583 : f32
    %93 = vector.broadcast %cst_25 : f32 to vector<4x512xf32>
    %94 = arith.mulf %93, %76 : vector<4x512xf32>
    %cst_26 = arith.constant 0.322467119 : f32
    %95 = vector.broadcast %cst_26 : f32 to vector<4x512xf32>
    %96 = arith.addf %94, %95 : vector<4x512xf32>
    %97 = arith.mulf %96, %76 : vector<4x512xf32>
    %cst_27 = arith.constant 2.44513416 : f32
    %98 = vector.broadcast %cst_27 : f32 to vector<4x512xf32>
    %99 = arith.addf %97, %98 : vector<4x512xf32>
    %100 = arith.mulf %99, %76 : vector<4x512xf32>
    %cst_28 = arith.constant 3.7544086 : f32
    %101 = vector.broadcast %cst_28 : f32 to vector<4x512xf32>
    %102 = arith.addf %100, %101 : vector<4x512xf32>
    %103 = arith.mulf %102, %76 : vector<4x512xf32>
    %cst_29 = arith.constant 1.000000e+00 : f32
    %104 = vector.broadcast %cst_29 : f32 to vector<4x512xf32>
    %105 = arith.addf %103, %104 : vector<4x512xf32>
    %cst_30 = arith.constant 2.425000e-02 : f32
    %106 = vector.broadcast %cst_30 : f32 to vector<4x512xf32>
    %107 = arith.cmpf olt, %37, %106 : vector<4x512xf32>
    %108 = arith.mulf %39, %56 : vector<4x512xf32>
    %109 = arith.select %107, %92, %108 : vector<4x512xi1>, vector<4x512xf32>
    %110 = arith.select %107, %105, %72 : vector<4x512xi1>, vector<4x512xf32>
    %111 = arith.divf %109, %110 : vector<4x512xf32>
    %cst_31 = arith.constant 5.000000e-01 : f32
    %112 = vector.broadcast %cst_31 : f32 to vector<4x512xf32>
    %113 = arith.cmpf olt, %34, %112 : vector<4x512xf32>
    %cst_32 = arith.constant 0.000000e+00 : f32
    %114 = vector.broadcast %cst_32 : f32 to vector<4x512xf32>
    %115 = arith.subf %114, %111 : vector<4x512xf32>
    %116 = arith.select %113, %111, %115 : vector<4x512xi1>, vector<4x512xf32>
    %cst_33 = arith.constant 1.000000e-01 : f32
    %117 = vector.broadcast %cst_33 : f32 to vector<4x512xf32>
    %118 = arith.mulf %117, %116 : vector<4x512xf32>
    %cst_34 = arith.constant 1.000000e+00 : f32
    %119 = vector.broadcast %cst_34 : f32 to vector<4x512xf32>
    %120 = arith.addf %119, %118 : vector<4x512xf32>
    %121 = arith.mulf %0, %120 : vector<4x512xf32>
    %c0_35 = arith.constant 0 : index
    %c0_36 = arith.constant 0 : index
    %122 = vector.load %arg3[%c0_35, %c0_36] : memref<4x512xf32, #tpu.memory_space<vmem>>, vector<4x512xf32>
    tpu.vector_store %arg3[%c0_35, %c0_36], %121 {strides = array<i32>} : memref<4x512xf32, #tpu.memory_space<vmem>>, vector<4x512xf32>,
    return
  }
  func.func @transform_0(%arg0: i32, %arg1: memref<1xi32, #tpu.memory_space<smem>>) -> (i32, i32) {
    %c0_i32 = arith.constant 0 : i32
    %c0_i32_0 = arith.constant 0 : i32
    return %arg0, %c0_i32 : i32, i32
  }
  func.func @transform_1(%arg0: i32, %arg1: memref<1xi32, #tpu.memory_space<smem>>) -> (i32, i32) {
    %c0_i32 = arith.constant 0 : i32
    %c0_i32_0 = arith.constant 0 : i32
    return %arg0, %c0_i32 : i32, i32
  }
}

</mosaic_0001>

<bundles_post_ra>
// kernel: tpu_custom_call.1
= control target key start
LH: loop header
LB: loop body
LE: loop exit
PB: predicated region body
PF: predicated region fallthrough
CT: control target
= control target key end

     0   :  { %8 = vsyncpa [#allocation5], 0  ;;  %s691_s0 = inlined_call_operand.<no memory space> [shape: s32[1], index: 0, kind: input, shape index: {}]   ;;  %s692_s1 = inlined_call_operand.hbm [shape: f32[4,512], index: 1, kind: input, shape index: {}]   ;;  %s693_s2 = inlined_call_operand.hbm [shape: f32[4,512], index: 2, kind: output, shape index: {}]  }
   0x1   :  { %9 = vsyncpa [#allocation6], 0  ;;  %s456_s9 = smov [#allocation4]   ;;  %s408_s13 = scalar_lea.hbm %s692_s1, 256 }
   0x2   :  { %s16_s10 = sshll.u32 %s456_s9, 4  ;;  %p409_p0 = scmp.ne.s32.totalorder %s692_s1, %s408_s13  ;;  %s17_s10 = int_to_ptr.vmem [resolvable:$true] %s16_s10 }
   0x3   :  { %p412_p1 = scmp.lt.u32.totalorder %s408_s13, %s692_s1 }
   0x5   :  { %p414_p2 = pnand %p412_p1, %p409_p0 }
   0x7   :  { %417 = shalt.err (!%p414_p2)
}
   0x8   :  { %s418_s18 = scalar_lea.vmem %s17_s10, 256  ;;  %p423_p4 = scmp.lt.s32.totalorder %s17_s10, %s17_s10 }
   0x9   :  { %p419_p3 = scmp.ne.s32.totalorder %s17_s10, %s418_s18  ;;  %p424_p5 = scmp.lt.s32.totalorder %s418_s18, %s418_s18 }
   0xb   :  { %p425_p6 = por %p424_p5, %p423_p4 }
   0xd   :  { %p426_p7 = pnand %p425_p6, %p419_p3 }
   0xf   :  { %429 = shalt.err (!%p426_p7)
}
  0x10   :  { %19 = dma.hbm_to_vmem [thread:$0]  %s692_s1, 256, %s17_s10, [#allocation5]  }
  0x11   :  { %452 = dma.done.wait [#allocation5], 256  }
  0x12   :  { %453 = vsyncadd [#allocation5], 4294967040  ;;  %v25_v0 = vlaneseq  ;;  %s41_s23 = smul.u32 2654435769, %s691_s0  ;;  %s457_s0 = smov [#allocation7]  }
  0x13   :  { %s369_s1 = sshll.u32 %s457_s0, 4  ;;  %s370_s1 = int_to_ptr.vmem [resolvable:$true] %s369_s1 }
  0x14   :  { %v26_v1 = vshrl.u32 %v25_v0, 7  ;;  %v28_v2 = vand.u32 127, %v25_v0  ;;  %v42_v7 = vstv %s41_s23  ;;  %s430_s24 = scalar_lea.vmem %s370_s1, 256  ;;  %p435_p9 = scmp.lt.s32.totalorder %s370_s1, %s370_s1 }
  0x15   :  { %p431_p8 = scmp.ne.s32.totalorder %s370_s1, %s430_s24  ;;  %p436_p10 = scmp.lt.s32.totalorder %s430_s24, %s430_s24 }
  0x16   :  { %v29_v3 = vadd.s32 128, %v28_v2  ;;  %v30_v4 = vadd.s32 256, %v28_v2  ;;  %v31_v5 = vadd.s32 384, %v28_v2  ;;  %v35_v6 = vmul.u32 512, %v26_v1 }
  0x17   :  { %p437_p11 = por %p436_p10, %p435_p9 }
  0x18   :  { %v36_v8 = vadd.s32 %v35_v6, %v28_v2  ;;  %v37_v9 = vadd.s32 %v35_v6, %v29_v3  ;;  %v38_v10 = vadd.s32 %v35_v6, %v30_v4  ;;  %v39_v11 = vadd.s32 %v35_v6, %v31_v5 }
  0x19   :  { %p438_p12 = pnand %p437_p11, %p431_p8 }
  0x1a   :  { %v43_v12 = vadd.s32 %v42_v7, %v36_v8  ;;  %v44_v13 = vadd.s32 %v42_v7, %v37_v9  ;;  %v45_v14 = vadd.s32 %v42_v7, %v38_v10  ;;  %v46_v15 = vadd.s32 %v42_v7, %v39_v11 }
  0x1c   :  { %v47_v16 = vadd.s32 2246822507, %v43_v12  ;;  %v48_v17 = vadd.s32 2246822507, %v44_v13  ;;  %v49_v18 = vadd.s32 2246822507, %v45_v14 }
  0x1d   :  { %v50_v19 = vadd.s32 2246822507, %v46_v15 }
  0x1e   :  { %v51_v20 = vshrl.u32 %v47_v16, 16  ;;  %v52_v21 = vshrl.u32 %v48_v17, 16  ;;  %v53_v22 = vshrl.u32 %v49_v18, 16 }
  0x1f   :  { %v54_v23 = vshrl.u32 %v50_v19, 16 }
  0x20   :  { %v55_v24 = vxor.u32 %v51_v20, %v47_v16  ;;  %v56_v25 = vxor.u32 %v52_v21, %v48_v17  ;;  %v57_v26 = vxor.u32 %v53_v22, %v49_v18 }
  0x21   :  { %v58_v27 = vxor.u32 %v54_v23, %v50_v19 }
  0x22   :  { %v59_v28 = vmul.u32 2146121005, %v55_v24  ;;  %v60_v29 = vmul.u32 2146121005, %v56_v25 }
  0x23   :  { %v61_v30 = vmul.u32 2146121005, %v57_v26  ;;  %v62_v31 = vmul.u32 2146121005, %v58_v27 }
  0x24   :  { %v63_v32 = vshrl.u32 %v59_v28, 15  ;;  %v64_v33 = vshrl.u32 %v60_v29, 15 }
  0x25   :  { %v65_v34 = vshrl.u32 %v61_v30, 15  ;;  %v66_v35 = vshrl.u32 %v62_v31, 15 }
  0x26   :  { %v67_v36 = vxor.u32 %v63_v32, %v59_v28  ;;  %v68_v37 = vxor.u32 %v64_v33, %v60_v29 }
  0x27   :  { %v69_v38 = vxor.u32 %v65_v34, %v61_v30  ;;  %v70_v39 = vxor.u32 %v66_v35, %v62_v31 }
  0x28   :  { %v71_v40 = vmul.u32 2221713035, %v67_v36  ;;  %v72_v41 = vmul.u32 2221713035, %v68_v37 }
  0x29   :  { %v73_v42 = vmul.u32 2221713035, %v69_v38  ;;  %v74_v43 = vmul.u32 2221713035, %v70_v39 }
  0x2a   :  { %v75_v44 = vshrl.u32 %v71_v40, 16  ;;  %v76_v45 = vshrl.u32 %v72_v41, 16 }
  0x2b   :  { %v77_v46 = vshrl.u32 %v73_v42, 16  ;;  %v78_v47 = vshrl.u32 %v74_v43, 16 }
  0x2c   :  { %v79_v48 = vxor.u32 %v75_v44, %v71_v40  ;;  %v80_v49 = vxor.u32 %v76_v45, %v72_v41 }
  0x2d   :  { %v81_v50 = vxor.u32 %v77_v46, %v73_v42  ;;  %v82_v51 = vxor.u32 %v78_v47, %v74_v43 }
  0x2e   :  { %v83_v52 = vshrl.u32 %v79_v48, 9  ;;  %v84_v53 = vshrl.u32 %v80_v49, 9 }
  0x2f   :  { %v85_v54 = vshrl.u32 %v81_v50, 9  ;;  %v86_v55 = vshrl.u32 %v82_v51, 9 }
  0x30   :  { %v87_v56 = vcvt.s32.f32 %v83_v52  ;;  %v88_v57 = vcvt.s32.f32 %v84_v53 }
  0x31   :  { %v89_v58 = vcvt.s32.f32 %v85_v54  ;;  %v90_v59 = vcvt.s32.f32 %v86_v55 }
  0x32   :  { %v91_v60 = vadd.f32 0.5, %v87_v56  ;;  %v92_v61 = vadd.f32 0.5, %v88_v57 }
  0x33   :  { %v93_v62 = vadd.f32 0.5, %v89_v58  ;;  %v94_v63 = vadd.f32 0.5, %v90_v59 }
  0x34   :  { %v488_v0 = vmul.f32 1.1920929e-07, %v91_v60  ;;  %v490_v1 = vmul.f32 1.1920929e-07, %v92_v61 }
  0x35   :  { %v492_v2 = vmul.f32 1.1920929e-07, %v93_v62  ;;  %v494_v3 = vmul.f32 1.1920929e-07, %v94_v63 }
  0x36   :  { %v99_v4 = vsub.f32 1.0, %v488_v0  ;;  %v100_v5 = vsub.f32 1.0, %v490_v1  ;;  %vm331_vm12 = vcmp.lt.f32.partialorder %v488_v0, 0.5  ;;  %vm332_vm13 = vcmp.lt.f32.partialorder %v490_v1, 0.5 }
  0x37   :  { %v101_v6 = vsub.f32 1.0, %v492_v2  ;;  %v102_v7 = vsub.f32 1.0, %v494_v3  ;;  %vm333_vm14 = vcmp.lt.f32.partialorder %v492_v2, 0.5  ;;  %vm334_vm15 = vcmp.lt.f32.partialorder %v494_v3, 0.5 }
  0x38   :  { %v501_v8 = vmin.f32 %v488_v0, %v99_v4  ;;  %v504_v9 = vmin.f32 %v490_v1, %v100_v5  ;;  %v23_v1 = vld [vmem:[#allocation4] sm:$0xff] }
  0x39   :  { %v507_v10 = vmin.f32 %v492_v2, %v101_v6  ;;  %v510_v11 = vmin.f32 %v494_v3, %v102_v7  ;;  %v24_v2 = vld [vmem:[#allocation4 + $0x8] sm:$0xff] }
  0x3a   :  { %v513_v12 = vadd.f32 -0.5, %v501_v8  ;;  %v516_v13 = vadd.f32 -0.5, %v504_v9  ;;  %384 = vlog2.f32 %v501_v8  ;;  %vm307_vm8 = vcmp.lt.f32.partialorder %v501_v8, 0.02425 }
  0x3b   :  { %v519_v14 = vadd.f32 -0.5, %v507_v10  ;;  %v522_v15 = vadd.f32 -0.5, %v510_v11  ;;  %386 = vlog2.f32 %v504_v9  ;;  %vm308_vm9 = vcmp.lt.f32.partialorder %v504_v9, 0.02425 }
  0x3c   :  { %v526_v16 = vmul.f32 %v513_v12, %v513_v12  ;;  %v530_v17 = vmul.f32 %v516_v13, %v516_v13  ;;  %388 = vlog2.f32 %v507_v10  ;;  %vm309_vm10 = vcmp.lt.f32.partialorder %v507_v10, 0.02425 }
  0x3d   :  { %v534_v18 = vmul.f32 %v519_v14, %v519_v14  ;;  %v540_v21 = vmul.f32 %v522_v15, %v522_v15  ;;  %390 = vlog2.f32 %v510_v11  ;;  %vm310_vm11 = vcmp.lt.f32.partialorder %v510_v11, 0.02425 }
  0x3e   :  { %v115_v19 = vmul.f32 -39.69683, %v526_v16  ;;  %v155_v20 = vmul.f32 -54.476097, %v526_v16  ;;  %v156_v22 = vmul.f32 -54.476097, %v530_v17 }
  0x3f   :  { %v157_v23 = vmul.f32 -54.476097, %v534_v18  ;;  %v116_v24 = vmul.f32 -39.69683, %v530_v17  ;;  %v117_v25 = vmul.f32 -39.69683, %v534_v18 }
  0x40   :  { %v119_v26 = vadd.f32 220.9461, %v115_v19  ;;  %v118_v27 = vmul.f32 -39.69683, %v540_v21  ;;  %v159_v28 = vadd.f32 161.58583, %v155_v20 }
  0x41   :  { %v160_v29 = vadd.f32 161.58583, %v156_v22  ;;  %v158_v30 = vmul.f32 -54.476097, %v540_v21  ;;  %v161_v31 = vadd.f32 161.58583, %v157_v23 }
  0x42   :  { %v163_v32 = vmul.f32 %v159_v28, %v526_v16  ;;  %v120_v33 = vadd.f32 220.9461, %v116_v24  ;;  %v121_v34 = vadd.f32 220.9461, %v117_v25  ;;  %v123_v35 = vmul.f32 %v119_v26, %v526_v16 }
  0x43   :  { %v122_v36 = vadd.f32 220.9461, %v118_v27  ;;  %v164_v37 = vmul.f32 %v160_v29, %v530_v17  ;;  %v162_v38 = vadd.f32 161.58583, %v158_v30  ;;  %v165_v39 = vmul.f32 %v161_v31, %v534_v18 }
  0x44   :  { %v167_v40 = vadd.f32 -155.69897, %v163_v32  ;;  %v124_v41 = vmul.f32 %v120_v33, %v530_v17  ;;  %v125_v42 = vmul.f32 %v121_v34, %v534_v18  ;;  %v127_v43 = vadd.f32 -275.9285, %v123_v35  ;;  %v385_v49 = vpop.eup %384 }
  0x45   :  { %v126_v44 = vmul.f32 %v122_v36, %v540_v21  ;;  %v168_v45 = vadd.f32 -155.69897, %v164_v37  ;;  %v166_v46 = vmul.f32 %v162_v38, %v540_v21  ;;  %v169_v47 = vadd.f32 -155.69897, %v165_v39  ;;  %v387_v53 = vpop.eup %386 }
  0x46   :  { %v171_v48 = vmul.f32 %v167_v40, %v526_v16  ;;  %v128_v50 = vadd.f32 -275.9285, %v124_v41  ;;  %v129_v51 = vadd.f32 -275.9285, %v125_v42  ;;  %v131_v52 = vmul.f32 %v127_v43, %v526_v16  ;;  %v389_v56 = vpop.eup %388 }
  0x47   :  { %v130_v54 = vadd.f32 -275.9285, %v126_v44  ;;  %v172_v55 = vmul.f32 %v168_v45, %v530_v17  ;;  %v170_v57 = vadd.f32 -155.69897, %v166_v46  ;;  %v173_v58 = vmul.f32 %v169_v47, %v534_v18  ;;  %v391_v59 = vpop.eup %390 }
  0x48   :  { %v175_v60 = vadd.f32 66.801315, %v171_v48  ;;  %v132_v61 = vmul.f32 %v128_v50, %v530_v17  ;;  %v133_v62 = vmul.f32 %v129_v51, %v534_v18  ;;  %v135_v63 = vadd.f32 138.35776, %v131_v52 }
  0x49   :  { %v134_v4 = vmul.f32 %v130_v54, %v540_v21  ;;  %v176_v5 = vadd.f32 66.801315, %v172_v55  ;;  %v196_v6 = vmul.f32 0.6931472, %v385_v49  ;;  %v198_v7 = vmul.f32 0.6931472, %v387_v53 }
  0x4a   :  { %v174_v19 = vmul.f32 %v170_v57, %v540_v21  ;;  %v177_v20 = vadd.f32 66.801315, %v173_v58  ;;  %v200_v22 = vmul.f32 0.6931472, %v389_v56  ;;  %v202_v23 = vmul.f32 0.6931472, %v391_v59 }
  0x4b   :  { %v179_v24 = vmul.f32 %v175_v60, %v526_v16  ;;  %v203_v25 = vmul.f32 -2.0, %v196_v6  ;;  %v204_v26 = vmul.f32 -2.0, %v198_v7  ;;  %v136_v27 = vadd.f32 138.35776, %v132_v61 }
  0x4c   :  { %v205_v28 = vmul.f32 -2.0, %v200_v22  ;;  %v206_v29 = vmul.f32 -2.0, %v202_v23  ;;  %v137_v30 = vadd.f32 138.35776, %v133_v62  ;;  %v138_v31 = vadd.f32 138.35776, %v134_v4 }
  0x4d   :  { %v139_v32 = vmul.f32 %v135_v63, %v526_v16  ;;  %392 = vrsqrt.f32 %v203_v25  ;;  %v178_v33 = vadd.f32 66.801315, %v174_v19  ;;  %v180_v34 = vmul.f32 %v176_v5, %v530_v17 }
  0x4e   :  { %v181_v35 = vmul.f32 %v177_v20, %v534_v18  ;;  %394 = vrsqrt.f32 %v204_v26  ;;  %v183_v36 = vadd.f32 -13.280682, %v179_v24  ;;  %v140_v37 = vmul.f32 %v136_v27, %v530_v17 }
  0x4f   :  { %396 = vrsqrt.f32 %v205_v28  ;;  %v141_v38 = vmul.f32 %v137_v30, %v534_v18  ;;  %v142_v39 = vmul.f32 %v138_v31, %v540_v21  ;;  %v143_v40 = vadd.f32 -30.664799, %v139_v32 }
  0x50   :  { %398 = vrsqrt.f32 %v206_v29  ;;  %v182_v41 = vmul.f32 %v178_v33, %v540_v21  ;;  %v184_v42 = vadd.f32 -13.280682, %v180_v34  ;;  %v185_v43 = vadd.f32 -13.280682, %v181_v35 }
  0x51   :  { %v187_v44 = vmul.f32 %v183_v36, %v526_v16  ;;  %v577_v45 = vadd.f32 -30.664799, %v140_v37  ;;  %v579_v46 = vadd.f32 -30.664799, %v141_v38  ;;  %v581_v47 = vadd.f32 -30.664799, %v142_v39 }
  0x52   :  { %v584_v48 = vmul.f32 %v143_v40, %v526_v16  ;;  %v186_v49 = vadd.f32 -13.280682, %v182_v41  ;;  %v587_v50 = vmul.f32 %v184_v42, %v530_v17  ;;  %v590_v51 = vmul.f32 %v185_v43, %v534_v18 }
  0x53   :  { %v592_v53 = vadd.f32 1.0, %v187_v44  ;;  %vm209_vm0 = vcmp.eq.f32.partialorder %v203_v25, inf  ;;  %vm211_vm1 = vcmp.eq.f32.partialorder %v203_v25, 0.0  ;;  %v212_v54 = vand.u32 2147483648, %v203_v25 }
  0x54   :  { %vm216_vm2 = vcmp.eq.f32.partialorder %v204_v26, inf  ;;  %vm218_vm3 = vcmp.eq.f32.partialorder %v204_v26, 0.0  ;;  %v219_v57 = vand.u32 2147483648, %v204_v26  ;;  %vm223_vm4 = vcmp.eq.f32.partialorder %v205_v28, inf }
  0x55   :  { %vm225_vm5 = vcmp.eq.f32.partialorder %v205_v28, 0.0  ;;  %v226_v59 = vand.u32 2147483648, %v205_v28  ;;  %vm230_vm6 = vcmp.eq.f32.partialorder %v206_v29, inf  ;;  %v233_v63 = vand.u32 2147483648, %v206_v29 }
  0x56   :  { %vm232_vm7 = vcmp.eq.f32.partialorder %v206_v29, 0.0 }
  0x57   :  { %v393_v52 = vpop.eup %392 }
  0x58   :  { %v395_v55 = vpop.eup %394  ;;  %v208_v56 = vmul.f32 %v393_v52, %v203_v25 }
  0x59   :  { %v397_v16 = vpop.eup %396  ;;  %v215_v58 = vmul.f32 %v395_v55, %v204_v26 }
  0x5a   :  { %v399_v60 = vpop.eup %398  ;;  %v210_v61 = vsel %vm209_vm0, %v203_v25, %v208_v56  ;;  %v222_v62 = vmul.f32 %v397_v16, %v205_v28 }
  0x5b   :  { %v595_v4 = vsel %vm211_vm1, %v212_v54, %v210_v61  ;;  %v217_v5 = vsel %vm216_vm2, %v204_v26, %v215_v58  ;;  %v229_v6 = vmul.f32 %v399_v60, %v206_v29 }
  0x5c   :  { %v598_v7 = vsel %vm218_vm3, %v219_v57, %v217_v5  ;;  %v224_v19 = vsel %vm223_vm4, %v205_v28, %v222_v62  ;;  %v235_v20 = vmul.f32 -0.007784894, %v595_v4  ;;  %v275_v22 = vmul.f32 0.007784696, %v595_v4 }
  0x5d   :  { %v602_v23 = vsel %vm225_vm5, %v226_v59, %v224_v19  ;;  %v231_v24 = vsel %vm230_vm6, %v206_v29, %v229_v6  ;;  %v236_v27 = vmul.f32 -0.007784894, %v598_v7  ;;  %v276_v25 = vmul.f32 0.007784696, %v598_v7 }
  0x5e   :  { %v606_v30 = vsel %vm232_vm7, %v233_v63, %v231_v24  ;;  %v237_v31 = vmul.f32 -0.007784894, %v602_v23  ;;  %v239_v32 = vadd.f32 -0.32239646, %v235_v20  ;;  %v277_v26 = vmul.f32 0.007784696, %v602_v23 }
  0x5f   :  { %v190_v28 = vmul.f32 %v186_v49, %v540_v21  ;;  %v238_v33 = vmul.f32 -0.007784894, %v606_v30  ;;  %v240_v34 = vadd.f32 -0.32239646, %v236_v27  ;;  %v278_v35 = vmul.f32 0.007784696, %v606_v30 }
  0x60   :  { %v241_v36 = vadd.f32 -0.32239646, %v237_v31  ;;  %v243_v29 = vmul.f32 %v239_v32, %v595_v4  ;;  %v279_v37 = vadd.f32 0.32246712, %v275_v22  ;;  %v280_v38 = vadd.f32 0.32246712, %v276_v25 }
  0x61   :  { %v242_v39 = vadd.f32 -0.32239646, %v238_v33  ;;  %v244_v40 = vmul.f32 %v240_v34, %v598_v7  ;;  %v281_v41 = vadd.f32 0.32246712, %v277_v26  ;;  %v282_v42 = vadd.f32 0.32246712, %v278_v35 }
  0x62   :  { %v245_v43 = vmul.f32 %v241_v36, %v602_v23  ;;  %v247_v44 = vadd.f32 -2.4007583, %v243_v29  ;;  %v283_v49 = vmul.f32 %v279_v37, %v595_v4  ;;  %v284_v52 = vmul.f32 %v280_v38, %v598_v7 }
  0x63   :  { %v246_v54 = vmul.f32 %v242_v39, %v606_v30  ;;  %v248_v55 = vadd.f32 -2.4007583, %v244_v40  ;;  %v285_v56 = vmul.f32 %v281_v41, %v602_v23  ;;  %v286_v57 = vmul.f32 %v282_v42, %v606_v30 }
  0x64   :  { %v249_v16 = vadd.f32 -2.4007583, %v245_v43  ;;  %v251_v58 = vmul.f32 %v247_v44, %v595_v4  ;;  %v287_v59 = vadd.f32 2.4451342, %v283_v49  ;;  %v288_v60 = vadd.f32 2.4451342, %v284_v52 }
  0x65   :  { %v250_v61 = vadd.f32 -2.4007583, %v246_v54  ;;  %v252_v62 = vmul.f32 %v248_v55, %v598_v7  ;;  %v289_v63 = vadd.f32 2.4451342, %v285_v56  ;;  %v290_v5 = vadd.f32 2.4451342, %v286_v57 }
  0x66   :  { %v253_v6 = vmul.f32 %v249_v16, %v602_v23  ;;  %v255_v19 = vadd.f32 -2.5497324, %v251_v58  ;;  %v291_v20 = vmul.f32 %v287_v59, %v595_v4  ;;  %v292_v22 = vmul.f32 %v288_v60, %v598_v7 }
  0x67   :  { %v254_v24 = vmul.f32 %v250_v61, %v606_v30  ;;  %v256_v27 = vadd.f32 -2.5497324, %v252_v62  ;;  %v293_v25 = vmul.f32 %v289_v63, %v602_v23  ;;  %v294_v31 = vmul.f32 %v290_v5, %v606_v30 }
  0x68   :  { %v257_v32 = vadd.f32 -2.5497324, %v253_v6  ;;  %v259_v26 = vmul.f32 %v255_v19, %v595_v4  ;;  %v295_v33 = vadd.f32 3.7544086, %v291_v20  ;;  %v296_v34 = vadd.f32 3.7544086, %v292_v22 }
  0x69   :  { %v258_v35 = vadd.f32 -2.5497324, %v254_v24  ;;  %v260_v36 = vmul.f32 %v256_v27, %v598_v7  ;;  %v297_v29 = vadd.f32 3.7544086, %v293_v25  ;;  %v298_v37 = vadd.f32 3.7544086, %v294_v31 }
  0x6a   :  { %v192_v38 = vadd.f32 1.0, %v587_v50  ;;  %v261_v39 = vmul.f32 %v257_v32, %v602_v23  ;;  %v299_v40 = vmul.f32 %v295_v33, %v595_v4  ;;  %v300_v41 = vmul.f32 %v296_v34, %v598_v7 }
  0x6b   :  { %v193_v42 = vadd.f32 1.0, %v590_v51  ;;  %v262_v43 = vmul.f32 %v258_v35, %v606_v30  ;;  %v301_v44 = vmul.f32 %v297_v29, %v602_v23  ;;  %v302_v49 = vmul.f32 %v298_v37, %v606_v30 }
  0x6c   :  { %v194_v52 = vadd.f32 1.0, %v190_v28  ;;  %v263_v54 = vadd.f32 4.3746643, %v259_v26  ;;  %v303_v55 = vadd.f32 1.0, %v299_v40  ;;  %v304_v56 = vadd.f32 1.0, %v300_v41 }
  0x6d   :  { %v148_v50 = vmul.f32 %v577_v45, %v530_v17  ;;  %v264_v57 = vadd.f32 4.3746643, %v260_v36  ;;  %v305_v16 = vadd.f32 1.0, %v301_v44  ;;  %v306_v58 = vadd.f32 1.0, %v302_v49 }
  0x6e   :  { %v149_v59 = vmul.f32 %v579_v46, %v534_v18  ;;  %v265_v51 = vadd.f32 4.3746643, %v261_v39  ;;  %v319_v60 = vsel %vm307_vm8, %v303_v55, %v592_v53  ;;  %v320_v28 = vsel %vm308_vm9, %v304_v56, %v192_v38 }
  0x6f   :  { %v150_v61 = vmul.f32 %v581_v47, %v540_v21  ;;  %v266_v62 = vadd.f32 4.3746643, %v262_v43  ;;  %v321_v17 = vsel %vm309_vm10, %v305_v16, %v193_v42  ;;  %v151_v45 = vadd.f32 2.5066283, %v584_v48 }
  0x70   :  { %v267_v63 = vmul.f32 %v263_v54, %v595_v4  ;;  %v322_v18 = vsel %vm310_vm11, %v306_v58, %v194_v52  ;;  %400 = vrcp.f32 %v319_v60  ;;  %v152_v46 = vadd.f32 2.5066283, %v148_v50 }
  0x71   :  { %v268_v53 = vmul.f32 %v264_v57, %v598_v7  ;;  %402 = vrcp.f32 %v320_v28  ;;  %v153_v5 = vadd.f32 2.5066283, %v149_v59  ;;  %v269_v6 = vmul.f32 %v265_v51, %v602_v23 }
  0x72   :  { %404 = vrcp.f32 %v321_v17  ;;  %v154_v21 = vadd.f32 2.5066283, %v150_v61  ;;  %v270_v47 = vmul.f32 %v266_v62, %v606_v30  ;;  %v271_v19 = vadd.f32 2.938164, %v267_v63 }
  0x73   :  { %406 = vrcp.f32 %v322_v18  ;;  %v311_v48 = vmul.f32 %v513_v12, %v151_v45  ;;  %v272_v4 = vadd.f32 2.938164, %v268_v53  ;;  %v312_v20 = vmul.f32 %v516_v13, %v152_v46 }
  0x74   :  { %v273_v22 = vadd.f32 2.938164, %v269_v6  ;;  %v313_v24 = vmul.f32 %v519_v14, %v153_v5  ;;  %v274_v27 = vadd.f32 2.938164, %v270_v47  ;;  %v314_v7 = vmul.f32 %v522_v15, %v154_v21 }
  0x75   :  { %v315_v23 = vsel %vm307_vm8, %v271_v19, %v311_v48  ;;  %v316_v25 = vsel %vm308_vm9, %v272_v4, %v312_v20 }
  0x76   :  { %v317_v31 = vsel %vm309_vm10, %v273_v22, %v313_v24  ;;  %v318_v13 = vsel %vm310_vm11, %v274_v27, %v314_v7 }
  0x7a   :  { %v401_v30 = vpop.eup %400 }
  0x7b   :  { %v403_v12 = vpop.eup %402  ;;  %v324_v32 = vmul.f32 %v401_v30, %v315_v23 }
  0x7c   :  { %v405_v26 = vpop.eup %404  ;;  %v326_v14 = vmul.f32 %v403_v12, %v316_v25 }
  0x7d   :  { %v407_v15 = vpop.eup %406  ;;  %v328_v33 = vmul.f32 %v405_v26, %v317_v31  ;;  %v335_v8 = vsub.f32 0.0, %v324_v32 }
  0x7e   :  { %v330_v9 = vmul.f32 %v407_v15, %v318_v13  ;;  %v336_v34 = vsub.f32 0.0, %v326_v14 }
  0x7f   :  { %v337_v10 = vsub.f32 0.0, %v328_v33  ;;  %v339_v35 = vsel %vm331_vm12, %v324_v32, %v335_v8 }
  0x80   :  { %v338_v11 = vsub.f32 0.0, %v330_v9  ;;  %v340_v36 = vsel %vm332_vm13, %v326_v14, %v336_v34  ;;  %v343_v29 = vmul.f32 0.1, %v339_v35 }
  0x81   :  { %v341_v37 = vsel %vm333_vm14, %v328_v33, %v337_v10  ;;  %v344_v38 = vmul.f32 0.1, %v340_v36 }
  0x82   :  { %v342_v39 = vsel %vm334_vm15, %v330_v9, %v338_v11  ;;  %v345_v0 = vmul.f32 0.1, %v341_v37  ;;  %v347_v40 = vadd.f32 1.0, %v343_v29 }
  0x83   :  { %v346_v41 = vmul.f32 0.1, %v342_v39  ;;  %v348_v42 = vadd.f32 1.0, %v344_v38 }
  0x84   :  { %v349_v43 = vadd.f32 1.0, %v345_v0 }
  0x85   :  { %v350_v44 = vadd.f32 1.0, %v346_v41  ;;  %v355_v49 = vcombine.low %v347_v40, %v348_v42 }
  0x87   :  { %v356_v3 = vcombine.low %v349_v43, %v350_v44  ;;  %v359_v52 = vmul.f32 %v355_v49, %v23_v1 }
  0x89   :  { %v360_v54 = vmul.f32 %v356_v3, %v24_v2  ;;  %361 = vst [vmem:[#allocation7] sm:$0xff] %v359_v52 }
  0x8b   :  { %362 = vst [vmem:[#allocation7 + $0x8] sm:$0xff] %v360_v54 }
  0x8c   :  { %441 = shalt.err (!%p438_p12)
}
  0x8d   :  { %s442_s27 = scalar_lea.hbm %s693_s2, 256 }
  0x8e   :  { %p443_p13 = scmp.ne.s32.totalorder %s693_s2, %s442_s27  ;;  %p446_p0 = scmp.lt.u32.totalorder %s442_s27, %s693_s2 }
  0x90   :  { %p448_p1 = pnand %p446_p0, %p443_p13 }
  0x92   :  { %451 = shalt.err (!%p448_p1)
}
  0x93   :  { %372 = dma.vmem_to_hbm [thread:$0]  %s370_s1, 256, %s693_s2, [#allocation6]  }
  0x94   :  { %454 = dma.done.wait [#allocation6], 256  }
  0x95   :  { %455 = vsyncadd [#allocation6], 4294967040 }
  0x96   :  { %376 = vsyncpa [#allocation5], 1 }
  0x97   :  { %377 = vsyncpa [#allocation6], 1 }

</bundles_post_ra>
